<compile_context>
chip_gen: v6e
topology: v6e:2x2x1
jax: 0.10.0
libtpu: 0.0.40
codegen_flags: <defaults>
</compile_context>

<pallas_src>
import jax
import jax.numpy as jnp
from jax.experimental import pallas as pl
from jax.experimental.pallas import tpu as pltpu  # noqa: F401  (kept for TPU backend import)


# ----------------------------- configuration -----------------------------
IN_DIM = 32        # in_feature_dim
QKV_DIM = 32       # qkv_dim
NUM_HEADS = 4      # num_heads (QKV_DIM % NUM_HEADS == 0)
MLP_FACTOR = 4.0
MLP_DIM = round(MLP_FACTOR * IN_DIM)   # 128
LN_EPS = 1e-5


# ----------------------------- Pallas kernel -----------------------------
def encoder_layer_kernel(
    x_ref,
    wqkv_ref, bqkv_ref, wo_ref, bo_ref,
    g1_ref, be1_ref, g2_ref, be2_ref,
    wf1_ref, bf1_ref, wf2_ref, bf2_ref,
    out_ref,
):
    N, Lq, D = x_ref.shape
    M = N * Lq
    H = NUM_HEADS
    Cqk = QKV_DIM // H
    Cv = QKV_DIM // H

    # Fold batch into rows for all row-wise math (clean sublane-only reshape: Lq == 8).
    x = x_ref[...].reshape(M, D).astype(jnp.float32)          # (M, D) f32

    def layer_norm(t, g_ref, b_ref):
        # LayerNorm always computed in float32 (matches the fp16-safe subclass).
        mu = jnp.mean(t, axis=-1, keepdims=True)
        d = t - mu
        var = jnp.mean(d * d, axis=-1, keepdims=True)
        return d * jax.lax.rsqrt(var + LN_EPS) * g_ref[...] + b_ref[...]

    x_n = layer_norm(x, g1_ref, be1_ref)                       # (M, D) f32

    # --- fused q/k/v projection: one bf16 MXU matmul, f32 accumulation ---
    # Columns: [ q (scale pre-folded) | k | v ]
    qkv = jnp.dot(x_n.astype(jnp.bfloat16), wqkv_ref[...],
                  preferred_element_type=jnp.float32) + bqkv_ref[...]   # (M, 3*QKV) f32
    qkv3 = qkv.reshape(N, Lq, 3 * QKV_DIM)                     # per-batch view for attention

    # --- per-head softmax attention, batched over N, summed through out-proj ---
    head_outs = []
    for h in range(H):                                         # H=4, static unrolled
        qh = qkv3[:, :, h * Cqk:(h + 1) * Cqk]                             # (N, Lq, Cqk)
        kh = qkv3[:, :, QKV_DIM + h * Cqk: QKV_DIM + (h + 1) * Cqk]        # (N, Lkv, Cqk)
        vh = qkv3[:, :, 2 * QKV_DIM + h * Cv: 2 * QKV_DIM + (h + 1) * Cv]  # (N, Lkv, Cv)

        s = jnp.einsum("nqc,nkc->nqk", qh, kh,
                       preferred_element_type=jnp.float32)     # (N, Lq, Lkv) f32
        s = s - jnp.max(s, axis=-1, keepdims=True)
        p = jnp.exp(s)
        p = p * pl.reciprocal(jnp.sum(p, axis=-1, keepdims=True), approx=True)
        mix_h = jnp.einsum("nqk,nkc->nqc", p, vh,
                           preferred_element_type=jnp.float32)  # (N, Lq, Cv) f32

        # Fold this head directly through its rows of the output projection:
        # concat_h(mix_h) @ Wo == sum_h mix_h @ Wo[h*Cv:(h+1)*Cv, :]
        head_outs.append(
            jnp.dot(mix_h.reshape(M, Cv).astype(jnp.bfloat16),
                    wo_ref[h * Cv:(h + 1) * Cv, :],
                    preferred_element_type=jnp.float32))        # (M, D) f32

    attn_out = sum(head_outs) + bo_ref[...]                     # (M, D) f32

    # --- first residual ---
    x1 = x + attn_out

    # --- MLP branch: fc1 -> QuickGELU -> (dropout=identity at p=0) -> fc2 ---
    x1_n = layer_norm(x1, g2_ref, be2_ref)
    h1 = jnp.dot(x1_n.astype(jnp.bfloat16), wf1_ref[...],
                 preferred_element_type=jnp.float32) + bf1_ref[...]        # (M, MLP_DIM)
    h1 = h1 * jax.nn.sigmoid(1.702 * h1)                       # QuickGELU (f32, EUP)
    h2 = jnp.dot(h1.astype(jnp.bfloat16), wf2_ref[...],
                 preferred_element_type=jnp.float32) + bf2_ref[...]        # (M, D)

    out = x1 + h2
    out_ref[...] = out.reshape(N, Lq, D).astype(out_ref.dtype)


# ----------------------------- wrapper -----------------------------
def prepare_fused_params(p):
    """Fuse q/k/v weights, fold the attention scale into q, pre-cast matmul weights to bf16."""
    scale = 1.0 / float(QKV_DIM // NUM_HEADS) ** 0.5
    w_qkv = jnp.concatenate([p["wq"] * scale, p["wk"], p["wv"]], axis=1)   # (D, 3*QKV)
    b_qkv = jnp.concatenate([p["bq"] * scale, p["bk"], p["bv"]], axis=1)   # (1, 3*QKV)
    return dict(
        w_qkv=w_qkv.astype(jnp.bfloat16), b_qkv=b_qkv.astype(jnp.float32),
        wo=p["wo"].astype(jnp.bfloat16), bo=p["bo"].astype(jnp.float32),
        g1=p["g1"], be1=p["be1"], g2=p["g2"], be2=p["be2"],
        wf1=p["wf1"].astype(jnp.bfloat16), bf1=p["bf1"].astype(jnp.float32),
        wf2=p["wf2"].astype(jnp.bfloat16), bf2=p["bf2"].astype(jnp.float32),
    )


@jax.jit
def transformer_encoder_layer(x, f):
    """x: (N, Lq, D) -> (N, Lq, D). Single gridless pallas_call; everything lives in VMEM."""
    N, Lq, D = x.shape
    return pl.pallas_call(
        encoder_layer_kernel,
        out_shape=jax.ShapeDtypeStruct((N, Lq, D), x.dtype),
        # No grid / no BlockSpecs: whole arrays are placed in VMEM and the kernel runs once,
        # eliminating all pipeline prologue/epilogue overhead at these tiny shapes.
    )(x,
      f["w_qkv"], f["b_qkv"], f["wo"], f["bo"],
      f["g1"], f["be1"], f["g2"], f["be2"],
      f["wf1"], f["bf1"], f["wf2"], f["bf2"])


# ----------------------------- parameter init -----------------------------
def xavier_uniform(key, fan_in, fan_out, shape):
    bound = (6.0 / (fan_in + fan_out)) ** 0.5
    return jax.random.uniform(key, shape, jnp.float32, -bound, bound)


def init_params(key):
    ks = jax.random.split(key, 8)
    p = {}
    # Attention projections (nn.Linear(in, out); stored as (in, out) so x @ W matches).
    p["wq"] = xavier_uniform(ks[0], IN_DIM, QKV_DIM, (IN_DIM, QKV_DIM))
    p["wk"] = xavier_uniform(ks[1], IN_DIM, QKV_DIM, (IN_DIM, QKV_DIM))
    p["wv"] = xavier_uniform(ks[2], IN_DIM, QKV_DIM, (IN_DIM, QKV_DIM))
    p["wo"] = xavier_uniform(ks[3], QKV_DIM, IN_DIM, (QKV_DIM, IN_DIM))
    p["bq"] = jnp.zeros((1, QKV_DIM), jnp.float32)
    p["bk"] = jnp.zeros((1, QKV_DIM), jnp.float32)
    p["bv"] = jnp.zeros((1, QKV_DIM), jnp.float32)
    p["bo"] = jnp.zeros((1, IN_DIM), jnp.float32)
    # MLP (xavier weights, normal(std=1e-6) biases).
    p["wf1"] = xavier_uniform(ks[4], IN_DIM, MLP_DIM, (IN_DIM, MLP_DIM))
    p["wf2"] = xavier_uniform(ks[5], MLP_DIM, IN_DIM, (MLP_DIM, IN_DIM))
    p["bf1"] = 1e-6 * jax.random.normal(ks[6], (1, MLP_DIM), jnp.float32)
    p["bf2"] = 1e-6 * jax.random.normal(ks[7], (1, IN_DIM), jnp.float32)
    # LayerNorms (gamma=1, beta=0).
    for name in ("1", "2"):
        p["g" + name] = jnp.ones((1, IN_DIM), jnp.float32)
        p["be" + name] = jnp.zeros((1, IN_DIM), jnp.float32)
    return p


# ----------------------------- pure-JAX reference (f32) -----------------------------
def reference_forward(x, p):
    def ln(t, g, b):
        mu = jnp.mean(t, axis=-1, keepdims=True)
        var = jnp.mean((t - mu) ** 2, axis=-1, keepdims=True)
        return (t - mu) / jnp.sqrt(var + LN_EPS) * g + b

    N, Lq, D = x.shape
    H = NUM_HEADS
    xn = ln(x, p["g1"][0], p["be1"][0])
    q = xn @ p["wq"] + p["bq"][0]
    k = xn @ p["wk"] + p["bk"][0]
    v = xn @ p["wv"] + p["bv"][0]
    Cqk = QKV_DIM // H
    Cv = QKV_DIM // H
    qh = q.reshape(N, Lq, H, Cqk)
    kh = k.reshape(N, Lq, H, Cqk)
    vh = v.reshape(N, Lq, H, Cv)
    aff = jnp.einsum("nqhc,nkhc->nqkh", qh / Cqk ** 0.5, kh)
    aff = jax.nn.softmax(aff, axis=-2)
    mix = jnp.einsum("nqlh,nlhc->nqhc", aff, vh).reshape(N, Lq, H * Cv)
    attn_out = mix @ p["wo"] + p["bo"][0]
    x1 = x + attn_out
    x1n = ln(x1, p["g2"][0], p["be2"][0])
    h1 = x1n @ p["wf1"] + p["bf1"][0]
    h1 = h1 * jax.nn.sigmoid(1.702 * h1)
    h2 = h1 @ p["wf2"] + p["bf2"][0]
    return x1 + h2


# ----------------------------- main -----------------------------
if __name__ == "__main__":
    key = jax.random.PRNGKey(0)
    k_x, k_p = jax.random.split(key)

    N, Lq = 2, 8
    x = jax.random.normal(k_x, (N, Lq, IN_DIM), jnp.float32)
    params = init_params(k_p)
    fused = prepare_fused_params(params)

    out = transformer_encoder_layer(x, fused)
    out = jax.block_until_ready(out)

    ref = reference_forward(x, params)
    assert out.shape == (N, Lq, IN_DIM)
    # bf16 matmul operands + approx reciprocal in the kernel -> loosened tolerance
    # (f32 reference); semantics errors would be orders of magnitude larger.
    assert jnp.allclose(out, ref, atol=5e-2, rtol=5e-2), (
        "mismatch vs reference, max abs diff = %e" % float(jnp.max(jnp.abs(out - ref))))

    print("KERNEL_OK")
</pallas_src>

<mosaic_0001>
module attributes {stable_mosaic.version = 11 : i64} {
  func.func @encoder_layer_kernel(%arg0: memref<2x8x32xf32, #tpu.memory_space<vmem>>, %arg1: memref<32x96xbf16, #tpu.memory_space<vmem>>, %arg2: memref<1x96xf32, #tpu.memory_space<vmem>>, %arg3: memref<32x32xbf16, #tpu.memory_space<vmem>>, %arg4: memref<1x32xf32, #tpu.memory_space<vmem>>, %arg5: memref<1x32xf32, #tpu.memory_space<vmem>>, %arg6: memref<1x32xf32, #tpu.memory_space<vmem>>, %arg7: memref<1x32xf32, #tpu.memory_space<vmem>>, %arg8: memref<1x32xf32, #tpu.memory_space<vmem>>, %arg9: memref<32x128xbf16, #tpu.memory_space<vmem>>, %arg10: memref<1x128xf32, #tpu.memory_space<vmem>>, %arg11: memref<128x32xbf16, #tpu.memory_space<vmem>>, %arg12: memref<1x32xf32, #tpu.memory_space<vmem>>, %arg13: memref<2x8x32xf32, #tpu.memory_space<vmem>>) attributes {dimension_semantics = [], scalar_prefetch = 0 : i64, scratch_operands = 0 : i64, tpu.core_type = #tpu.core_type<tc>} {
    %c0 = arith.constant 0 : index
    %c0_0 = arith.constant 0 : index
    %c0_1 = arith.constant 0 : index
    %0 = vector.load %arg0[%c0, %c0_0, %c0_1] : memref<2x8x32xf32, #tpu.memory_space<vmem>>, vector<2x8x32xf32>
    %1 = vector.shape_cast %0 : vector<2x8x32xf32> to vector<16x32xf32>
    %cst = arith.constant dense<0.000000e+00> : vector<16xf32>
    %2 = vector.multi_reduction <add>, %1, %cst [1] : vector<16x32xf32> to vector<16xf32>
    %3 = vector.shape_cast %2 : vector<16xf32> to vector<16x1xf32>
    %cst_2 = arith.constant 3.200000e+01 : f32
    %4 = vector.broadcast %cst_2 : f32 to vector<16x1xf32>
    %5 = arith.divf %3, %4 : vector<16x1xf32>
    %6 = vector.broadcast %5 : vector<16x1xf32> to vector<16x32xf32>
    %7 = arith.subf %1, %6 : vector<16x32xf32>
    %8 = arith.mulf %7, %7 : vector<16x32xf32>
    %cst_3 = arith.constant dense<0.000000e+00> : vector<16xf32>
    %9 = vector.multi_reduction <add>, %8, %cst_3 [1] : vector<16x32xf32> to vector<16xf32>
    %10 = vector.shape_cast %9 : vector<16xf32> to vector<16x1xf32>
    %cst_4 = arith.constant 3.200000e+01 : f32
    %11 = vector.broadcast %cst_4 : f32 to vector<16x1xf32>
    %12 = arith.divf %10, %11 : vector<16x1xf32>
    %cst_5 = arith.constant 9.99999974E-6 : f32
    %13 = vector.broadcast %cst_5 : f32 to vector<16x1xf32>
    %14 = arith.addf %12, %13 : vector<16x1xf32>
    %15 = math.rsqrt %14 : vector<16x1xf32>
    %16 = vector.broadcast %15 : vector<16x1xf32> to vector<16x32xf32>
    %17 = arith.mulf %7, %16 : vector<16x32xf32>
    %c0_6 = arith.constant 0 : index
    %c0_7 = arith.constant 0 : index
    %18 = vector.load %arg5[%c0_6, %c0_7] : memref<1x32xf32, #tpu.memory_space<vmem>>, vector<1x32xf32>
    %19 = vector.broadcast %18 : vector<1x32xf32> to vector<16x32xf32>
    %20 = arith.mulf %17, %19 : vector<16x32xf32>
    %c0_8 = arith.constant 0 : index
    %c0_9 = arith.constant 0 : index
    %21 = vector.load %arg6[%c0_8, %c0_9] : memref<1x32xf32, #tpu.memory_space<vmem>>, vector<1x32xf32>
    %22 = vector.broadcast %21 : vector<1x32xf32> to vector<16x32xf32>
    %23 = arith.addf %20, %22 : vector<16x32xf32>
    %24 = arith.truncf %23 : vector<16x32xf32> to vector<16x32xbf16>
    %c0_10 = arith.constant 0 : index
    %c0_11 = arith.constant 0 : index
    %25 = vector.load %arg1[%c0_10, %c0_11] : memref<32x96xbf16, #tpu.memory_space<vmem>>, vector<32x96xbf16>
    %cst_12 = arith.constant dense<0.000000e+00> : vector<16x96xf32>
    %26 = tpu.matmul %24, %25, %cst_12 {dimension_numbers = #tpu.dot_dimension_numbers<[1], [0], [0], [1], [0, 0, 1, 1], [], []>} : vector<16x32xbf16>, vector<32x96xbf16>, vector<16x96xf32> -> vector<16x96xf32>
    %c0_13 = arith.constant 0 : index
    %c0_14 = arith.constant 0 : index
    %27 = vector.load %arg2[%c0_13, %c0_14] : memref<1x96xf32, #tpu.memory_space<vmem>>, vector<1x96xf32>
    %28 = vector.broadcast %27 : vector<1x96xf32> to vector<16x96xf32>
    %29 = arith.addf %26, %28 : vector<16x96xf32>
    %30 = vector.shape_cast %29 : vector<16x96xf32> to vector<2x8x96xf32>
    %31 = vector.extract_strided_slice %30 {offsets = [0, 0, 0], sizes = [2, 8, 8], strides = [1, 1, 1]} : vector<2x8x96xf32> to vector<2x8x8xf32>
    %32 = vector.extract_strided_slice %30 {offsets = [0, 0, 32], sizes = [2, 8, 8], strides = [1, 1, 1]} : vector<2x8x96xf32> to vector<2x8x8xf32>
    %33 = vector.extract_strided_slice %30 {offsets = [0, 0, 64], sizes = [2, 8, 8], strides = [1, 1, 1]} : vector<2x8x96xf32> to vector<2x8x8xf32>
    "tpu.trace_start"() <{level = 10 : i32, message = "nqc,nkc->nqk"}> : () -> ()
    %cst_15 = arith.constant dense<0.000000e+00> : vector<2x8x8xf32>
    %34 = tpu.matmul %31, %32, %cst_15 {dimension_numbers = #tpu.dot_dimension_numbers<[2], [2], [1], [1], [0, 0, 0, 1, 1, 1], [0], [0]>} : vector<2x8x8xf32>, vector<2x8x8xf32>, vector<2x8x8xf32> -> vector<2x8x8xf32>
    "tpu.trace_stop"() : () -> ()
    %cst_16 = arith.constant dense<0xFF800000> : vector<2x8xf32>
    %35 = vector.multi_reduction <maximumf>, %34, %cst_16 [2] : vector<2x8x8xf32> to vector<2x8xf32>
    %36 = vector.shape_cast %35 : vector<2x8xf32> to vector<2x8x1xf32>
    %37 = vector.broadcast %36 : vector<2x8x1xf32> to vector<2x8x8xf32>
    %38 = arith.subf %34, %37 : vector<2x8x8xf32>
    %39 = math.exp %38 : vector<2x8x8xf32>
    %cst_17 = arith.constant dense<0.000000e+00> : vector<2x8xf32>
    %40 = vector.multi_reduction <add>, %39, %cst_17 [2] : vector<2x8x8xf32> to vector<2x8xf32>
    %41 = vector.shape_cast %40 : vector<2x8xf32> to vector<2x8x1xf32>
    %42 = tpu.reciprocal %41 {approx = true} : vector<2x8x1xf32> -> vector<2x8x1xf32>
    %43 = vector.broadcast %42 : vector<2x8x1xf32> to vector<2x8x8xf32>
    %44 = arith.mulf %39, %43 : vector<2x8x8xf32>
    "tpu.trace_start"() <{level = 10 : i32, message = "nqk,nkc->nqc"}> : () -> ()
    %cst_18 = arith.constant dense<0.000000e+00> : vector<2x8x8xf32>
    %45 = tpu.matmul %44, %33, %cst_18 {dimension_numbers = #tpu.dot_dimension_numbers<[2], [1], [1], [2], [0, 0, 0, 1, 1, 2], [0], [0]>} : vector<2x8x8xf32>, vector<2x8x8xf32>, vector<2x8x8xf32> -> vector<2x8x8xf32>
    "tpu.trace_stop"() : () -> ()
    %46 = vector.shape_cast %45 : vector<2x8x8xf32> to vector<16x8xf32>
    %47 = arith.truncf %46 : vector<16x8xf32> to vector<16x8xbf16>
    %c0_19 = arith.constant 0 : index
    %c0_20 = arith.constant 0 : index
    %48 = vector.load %arg3[%c0_19, %c0_20] : memref<32x32xbf16, #tpu.memory_space<vmem>>, vector<8x32xbf16>
    %cst_21 = arith.constant dense<0.000000e+00> : vector<16x32xf32>
    %49 = tpu.matmul %47, %48, %cst_21 {dimension_numbers = #tpu.dot_dimension_numbers<[1], [0], [0], [1], [0, 0, 1, 1], [], []>} : vector<16x8xbf16>, vector<8x32xbf16>, vector<16x32xf32> -> vector<16x32xf32>
    %50 = vector.extract_strided_slice %30 {offsets = [0, 0, 8], sizes = [2, 8, 8], strides = [1, 1, 1]} : vector<2x8x96xf32> to vector<2x8x8xf32>
    %51 = vector.extract_strided_slice %30 {offsets = [0, 0, 40], sizes = [2, 8, 8], strides = [1, 1, 1]} : vector<2x8x96xf32> to vector<2x8x8xf32>
    %52 = vector.extract_strided_slice %30 {offsets = [0, 0, 72], sizes = [2, 8, 8], strides = [1, 1, 1]} : vector<2x8x96xf32> to vector<2x8x8xf32>
    "tpu.trace_start"() <{level = 10 : i32, message = "nqc,nkc->nqk"}> : () -> ()
    %cst_22 = arith.constant dense<0.000000e+00> : vector<2x8x8xf32>
    %53 = tpu.matmul %50, %51, %cst_22 {dimension_numbers = #tpu.dot_dimension_numbers<[2], [2], [1], [1], [0, 0, 0, 1, 1, 1], [0], [0]>} : vector<2x8x8xf32>, vector<2x8x8xf32>, vector<2x8x8xf32> -> vector<2x8x8xf32>
    "tpu.trace_stop"() : () -> ()
    %cst_23 = arith.constant dense<0xFF800000> : vector<2x8xf32>
    %54 = vector.multi_reduction <maximumf>, %53, %cst_23 [2] : vector<2x8x8xf32> to vector<2x8xf32>
    %55 = vector.shape_cast %54 : vector<2x8xf32> to vector<2x8x1xf32>
    %56 = vector.broadcast %55 : vector<2x8x1xf32> to vector<2x8x8xf32>
    %57 = arith.subf %53, %56 : vector<2x8x8xf32>
    %58 = math.exp %57 : vector<2x8x8xf32>
    %cst_24 = arith.constant dense<0.000000e+00> : vector<2x8xf32>
    %59 = vector.multi_reduction <add>, %58, %cst_24 [2] : vector<2x8x8xf32> to vector<2x8xf32>
    %60 = vector.shape_cast %59 : vector<2x8xf32> to vector<2x8x1xf32>
    %61 = tpu.reciprocal %60 {approx = true} : vector<2x8x1xf32> -> vector<2x8x1xf32>
    %62 = vector.broadcast %61 : vector<2x8x1xf32> to vector<2x8x8xf32>
    %63 = arith.mulf %58, %62 : vector<2x8x8xf32>
    "tpu.trace_start"() <{level = 10 : i32, message = "nqk,nkc->nqc"}> : () -> ()
    %cst_25 = arith.constant dense<0.000000e+00> : vector<2x8x8xf32>
    %64 = tpu.matmul %63, %52, %cst_25 {dimension_numbers = #tpu.dot_dimension_numbers<[2], [1], [1], [2], [0, 0, 0, 1, 1, 2], [0], [0]>} : vector<2x8x8xf32>, vector<2x8x8xf32>, vector<2x8x8xf32> -> vector<2x8x8xf32>
    "tpu.trace_stop"() : () -> ()
    %65 = vector.shape_cast %64 : vector<2x8x8xf32> to vector<16x8xf32>
    %66 = arith.truncf %65 : vector<16x8xf32> to vector<16x8xbf16>
    %c8 = arith.constant 8 : index
    %c0_26 = arith.constant 0 : index
    %67 = vector.load %arg3[%c8, %c0_26] : memref<32x32xbf16, #tpu.memory_space<vmem>>, vector<8x32xbf16>
    %cst_27 = arith.constant dense<0.000000e+00> : vector<16x32xf32>
    %68 = tpu.matmul %66, %67, %cst_27 {dimension_numbers = #tpu.dot_dimension_numbers<[1], [0], [0], [1], [0, 0, 1, 1], [], []>} : vector<16x8xbf16>, vector<8x32xbf16>, vector<16x32xf32> -> vector<16x32xf32>
    %69 = vector.extract_strided_slice %30 {offsets = [0, 0, 16], sizes = [2, 8, 8], strides = [1, 1, 1]} : vector<2x8x96xf32> to vector<2x8x8xf32>
    %70 = vector.extract_strided_slice %30 {offsets = [0, 0, 48], sizes = [2, 8, 8], strides = [1, 1, 1]} : vector<2x8x96xf32> to vector<2x8x8xf32>
    %71 = vector.extract_strided_slice %30 {offsets = [0, 0, 80], sizes = [2, 8, 8], strides = [1, 1, 1]} : vector<2x8x96xf32> to vector<2x8x8xf32>
    "tpu.trace_start"() <{level = 10 : i32, message = "nqc,nkc->nqk"}> : () -> ()
    %cst_28 = arith.constant dense<0.000000e+00> : vector<2x8x8xf32>
    %72 = tpu.matmul %69, %70, %cst_28 {dimension_numbers = #tpu.dot_dimension_numbers<[2], [2], [1], [1], [0, 0, 0, 1, 1, 1], [0], [0]>} : vector<2x8x8xf32>, vector<2x8x8xf32>, vector<2x8x8xf32> -> vector<2x8x8xf32>
    "tpu.trace_stop"() : () -> ()
    %cst_29 = arith.constant dense<0xFF800000> : vector<2x8xf32>
    %73 = vector.multi_reduction <maximumf>, %72, %cst_29 [2] : vector<2x8x8xf32> to vector<2x8xf32>
    %74 = vector.shape_cast %73 : vector<2x8xf32> to vector<2x8x1xf32>
    %75 = vector.broadcast %74 : vector<2x8x1xf32> to vector<2x8x8xf32>
    %76 = arith.subf %72, %75 : vector<2x8x8xf32>
    %77 = math.exp %76 : vector<2x8x8xf32>
    %cst_30 = arith.constant dense<0.000000e+00> : vector<2x8xf32>
    %78 = vector.multi_reduction <add>, %77, %cst_30 [2] : vector<2x8x8xf32> to vector<2x8xf32>
    %79 = vector.shape_cast %78 : vector<2x8xf32> to vector<2x8x1xf32>
    %80 = tpu.reciprocal %79 {approx = true} : vector<2x8x1xf32> -> vector<2x8x1xf32>
    %81 = vector.broadcast %80 : vector<2x8x1xf32> to vector<2x8x8xf32>
    %82 = arith.mulf %77, %81 : vector<2x8x8xf32>
    "tpu.trace_start"() <{level = 10 : i32, message = "nqk,nkc->nqc"}> : () -> ()
    %cst_31 = arith.constant dense<0.000000e+00> : vector<2x8x8xf32>
    %83 = tpu.matmul %82, %71, %cst_31 {dimension_numbers = #tpu.dot_dimension_numbers<[2], [1], [1], [2], [0, 0, 0, 1, 1, 2], [0], [0]>} : vector<2x8x8xf32>, vector<2x8x8xf32>, vector<2x8x8xf32> -> vector<2x8x8xf32>
    "tpu.trace_stop"() : () -> ()
    %84 = vector.shape_cast %83 : vector<2x8x8xf32> to vector<16x8xf32>
    %85 = arith.truncf %84 : vector<16x8xf32> to vector<16x8xbf16>
    %c16 = arith.constant 16 : index
    %c0_32 = arith.constant 0 : index
    %86 = vector.load %arg3[%c16, %c0_32] : memref<32x32xbf16, #tpu.memory_space<vmem>>, vector<8x32xbf16>
    %cst_33 = arith.constant dense<0.000000e+00> : vector<16x32xf32>
    %87 = tpu.matmul %85, %86, %cst_33 {dimension_numbers = #tpu.dot_dimension_numbers<[1], [0], [0], [1], [0, 0, 1, 1], [], []>} : vector<16x8xbf16>, vector<8x32xbf16>, vector<16x32xf32> -> vector<16x32xf32>
    %88 = vector.extract_strided_slice %30 {offsets = [0, 0, 24], sizes = [2, 8, 8], strides = [1, 1, 1]} : vector<2x8x96xf32> to vector<2x8x8xf32>
    %89 = vector.extract_strided_slice %30 {offsets = [0, 0, 56], sizes = [2, 8, 8], strides = [1, 1, 1]} : vector<2x8x96xf32> to vector<2x8x8xf32>
    %90 = vector.extract_strided_slice %30 {offsets = [0, 0, 88], sizes = [2, 8, 8], strides = [1, 1, 1]} : vector<2x8x96xf32> to vector<2x8x8xf32>
    "tpu.trace_start"() <{level = 10 : i32, message = "nqc,nkc->nqk"}> : () -> ()
    %cst_34 = arith.constant dense<0.000000e+00> : vector<2x8x8xf32>
    %91 = tpu.matmul %88, %89, %cst_34 {dimension_numbers = #tpu.dot_dimension_numbers<[2], [2], [1], [1], [0, 0, 0, 1, 1, 1], [0], [0]>} : vector<2x8x8xf32>, vector<2x8x8xf32>, vector<2x8x8xf32> -> vector<2x8x8xf32>
    "tpu.trace_stop"() : () -> ()
    %cst_35 = arith.constant dense<0xFF800000> : vector<2x8xf32>
    %92 = vector.multi_reduction <maximumf>, %91, %cst_35 [2] : vector<2x8x8xf32> to vector<2x8xf32>
    %93 = vector.shape_cast %92 : vector<2x8xf32> to vector<2x8x1xf32>
    %94 = vector.broadcast %93 : vector<2x8x1xf32> to vector<2x8x8xf32>
    %95 = arith.subf %91, %94 : vector<2x8x8xf32>
    %96 = math.exp %95 : vector<2x8x8xf32>
    %cst_36 = arith.constant dense<0.000000e+00> : vector<2x8xf32>
    %97 = vector.multi_reduction <add>, %96, %cst_36 [2] : vector<2x8x8xf32> to vector<2x8xf32>
    %98 = vector.shape_cast %97 : vector<2x8xf32> to vector<2x8x1xf32>
    %99 = tpu.reciprocal %98 {approx = true} : vector<2x8x1xf32> -> vector<2x8x1xf32>
    %100 = vector.broadcast %99 : vector<2x8x1xf32> to vector<2x8x8xf32>
    %101 = arith.mulf %96, %100 : vector<2x8x8xf32>
    "tpu.trace_start"() <{level = 10 : i32, message = "nqk,nkc->nqc"}> : () -> ()
    %cst_37 = arith.constant dense<0.000000e+00> : vector<2x8x8xf32>
    %102 = tpu.matmul %101, %90, %cst_37 {dimension_numbers = #tpu.dot_dimension_numbers<[2], [1], [1], [2], [0, 0, 0, 1, 1, 2], [0], [0]>} : vector<2x8x8xf32>, vector<2x8x8xf32>, vector<2x8x8xf32> -> vector<2x8x8xf32>
    "tpu.trace_stop"() : () -> ()
    %103 = vector.shape_cast %102 : vector<2x8x8xf32> to vector<16x8xf32>
    %104 = arith.truncf %103 : vector<16x8xf32> to vector<16x8xbf16>
    %c24 = arith.constant 24 : index
    %c0_38 = arith.constant 0 : index
    %105 = vector.load %arg3[%c24, %c0_38] : memref<32x32xbf16, #tpu.memory_space<vmem>>, vector<8x32xbf16>
    %cst_39 = arith.constant dense<0.000000e+00> : vector<16x32xf32>
    %106 = tpu.matmul %104, %105, %cst_39 {dimension_numbers = #tpu.dot_dimension_numbers<[1], [0], [0], [1], [0, 0, 1, 1], [], []>} : vector<16x8xbf16>, vector<8x32xbf16>, vector<16x32xf32> -> vector<16x32xf32>
    %cst_40 = arith.constant 0.000000e+00 : f32
    %107 = vector.broadcast %cst_40 : f32 to vector<16x32xf32>
    %108 = arith.addf %107, %49 : vector<16x32xf32>
    %109 = arith.addf %108, %68 : vector<16x32xf32>
    %110 = arith.addf %109, %87 : vector<16x32xf32>
    %111 = arith.addf %110, %106 : vector<16x32xf32>
    %c0_41 = arith.constant 0 : index
    %c0_42 = arith.constant 0 : index
    %112 = vector.load %arg4[%c0_41, %c0_42] : memref<1x32xf32, #tpu.memory_space<vmem>>, vector<1x32xf32>
    %113 = vector.broadcast %112 : vector<1x32xf32> to vector<16x32xf32>
    %114 = arith.addf %111, %113 : vector<16x32xf32>
    %115 = arith.addf %1, %114 : vector<16x32xf32>
    %cst_43 = arith.constant dense<0.000000e+00> : vector<16xf32>
    %116 = vector.multi_reduction <add>, %115, %cst_43 [1] : vector<16x32xf32> to vector<16xf32>
    %117 = vector.shape_cast %116 : vector<16xf32> to vector<16x1xf32>
    %cst_44 = arith.constant 3.200000e+01 : f32
    %118 = vector.broadcast %cst_44 : f32 to vector<16x1xf32>
    %119 = arith.divf %117, %118 : vector<16x1xf32>
    %120 = vector.broadcast %119 : vector<16x1xf32> to vector<16x32xf32>
    %121 = arith.subf %115, %120 : vector<16x32xf32>
    %122 = arith.mulf %121, %121 : vector<16x32xf32>
    %cst_45 = arith.constant dense<0.000000e+00> : vector<16xf32>
    %123 = vector.multi_reduction <add>, %122, %cst_45 [1] : vector<16x32xf32> to vector<16xf32>
    %124 = vector.shape_cast %123 : vector<16xf32> to vector<16x1xf32>
    %cst_46 = arith.constant 3.200000e+01 : f32
    %125 = vector.broadcast %cst_46 : f32 to vector<16x1xf32>
    %126 = arith.divf %124, %125 : vector<16x1xf32>
    %cst_47 = arith.constant 9.99999974E-6 : f32
    %127 = vector.broadcast %cst_47 : f32 to vector<16x1xf32>
    %128 = arith.addf %126, %127 : vector<16x1xf32>
    %129 = math.rsqrt %128 : vector<16x1xf32>
    %130 = vector.broadcast %129 : vector<16x1xf32> to vector<16x32xf32>
    %131 = arith.mulf %121, %130 : vector<16x32xf32>
    %c0_48 = arith.constant 0 : index
    %c0_49 = arith.constant 0 : index
    %132 = vector.load %arg7[%c0_48, %c0_49] : memref<1x32xf32, #tpu.memory_space<vmem>>, vector<1x32xf32>
    %133 = vector.broadcast %132 : vector<1x32xf32> to vector<16x32xf32>
    %134 = arith.mulf %131, %133 : vector<16x32xf32>
    %c0_50 = arith.constant 0 : index
    %c0_51 = arith.constant 0 : index
    %135 = vector.load %arg8[%c0_50, %c0_51] : memref<1x32xf32, #tpu.memory_space<vmem>>, vector<1x32xf32>
    %136 = vector.broadcast %135 : vector<1x32xf32> to vector<16x32xf32>
    %137 = arith.addf %134, %136 : vector<16x32xf32>
    %138 = arith.truncf %137 : vector<16x32xf32> to vector<16x32xbf16>
    %c0_52 = arith.constant 0 : index
    %c0_53 = arith.constant 0 : index
    %139 = vector.load %arg9[%c0_52, %c0_53] : memref<32x128xbf16, #tpu.memory_space<vmem>>, vector<32x128xbf16>
    %cst_54 = arith.constant dense<0.000000e+00> : vector<16x128xf32>
    %140 = tpu.matmul %138, %139, %cst_54 {dimension_numbers = #tpu.dot_dimension_numbers<[1], [0], [0], [1], [0, 0, 1, 1], [], []>} : vector<16x32xbf16>, vector<32x128xbf16>, vector<16x128xf32> -> vector<16x128xf32>
    %c0_55 = arith.constant 0 : index
    %c0_56 = arith.constant 0 : index
    %141 = vector.load %arg10[%c0_55, %c0_56] : memref<1x128xf32, #tpu.memory_space<vmem>>, vector<1x128xf32>
    %142 = vector.broadcast %141 : vector<1x128xf32> to vector<16x128xf32>
    %143 = arith.addf %140, %142 : vector<16x128xf32>
    %cst_57 = arith.constant 1.702000e+00 : f32
    %144 = vector.broadcast %cst_57 : f32 to vector<16x128xf32>
    %145 = arith.mulf %144, %143 : vector<16x128xf32>
    %146 = arith.negf %145 : vector<16x128xf32>
    %147 = math.exp %146 : vector<16x128xf32>
    %cst_58 = arith.constant 1.000000e+00 : f32
    %148 = vector.broadcast %cst_58 : f32 to vector<16x128xf32>
    %149 = arith.addf %148, %147 : vector<16x128xf32>
    %150 = arith.divf %148, %149 : vector<16x128xf32>
    %151 = arith.mulf %143, %150 : vector<16x128xf32>
    %152 = arith.truncf %151 : vector<16x128xf32> to vector<16x128xbf16>
    %c0_59 = arith.constant 0 : index
    %c0_60 = arith.constant 0 : index
    %153 = vector.load %arg11[%c0_59, %c0_60] : memref<128x32xbf16, #tpu.memory_space<vmem>>, vector<128x32xbf16>
    %cst_61 = arith.constant dense<0.000000e+00> : vector<16x32xf32>
    %154 = tpu.matmul %152, %153, %cst_61 {dimension_numbers = #tpu.dot_dimension_numbers<[1], [0], [0], [1], [0, 0, 1, 1], [], []>} : vector<16x128xbf16>, vector<128x32xbf16>, vector<16x32xf32> -> vector<16x32xf32>
    %c0_62 = arith.constant 0 : index
    %c0_63 = arith.constant 0 : index
    %155 = vector.load %arg12[%c0_62, %c0_63] : memref<1x32xf32, #tpu.memory_space<vmem>>, vector<1x32xf32>
    %156 = vector.broadcast %155 : vector<1x32xf32> to vector<16x32xf32>
    %157 = arith.addf %154, %156 : vector<16x32xf32>
    %158 = arith.addf %115, %157 : vector<16x32xf32>
    %159 = vector.shape_cast %158 : vector<16x32xf32> to vector<2x8x32xf32>
    %c0_64 = arith.constant 0 : index
    %c0_65 = arith.constant 0 : index
    %c0_66 = arith.constant 0 : index
    %160 = vector.load %arg13[%c0_64, %c0_65, %c0_66] : memref<2x8x32xf32, #tpu.memory_space<vmem>>, vector<2x8x32xf32>
    tpu.vector_store %arg13[%c0_64, %c0_65, %c0_66], %159 {strides = array<i32>} : memref<2x8x32xf32, #tpu.memory_space<vmem>>, vector<2x8x32xf32>,
    return
  }
}

</mosaic_0001>

<bundles_post_ra>
// kernel: transformer_encoder_layer.1
= control target key start
LH: loop header
LB: loop body
LE: loop exit
PB: predicated region body
PF: predicated region fallthrough
CT: control target
= control target key end

     0   :  { %vm48_vm0 = vcmask 261120   ;;  %s2673_s0 = inlined_call_operand.vmem [shape: f32[2,8,32], index: 0, kind: input, shape index: {}]   ;;  %s2674_s1 = inlined_call_operand.vmem [shape: bf16[32,96], index: 1, kind: input, shape index: {}]   ;;  %s2675_s2 = inlined_call_operand.vmem [shape: f32[1,96], index: 2, kind: input, shape index: {}]   ;;  %s2676_s3 = inlined_call_operand.vmem [shape: bf16[32,32], index: 3, kind: input, shape index: {}]   ;;  %s2677_s4 = inlined_call_operand.vmem [shape: f32[1,32], index: 4, kind: input, shape index: {}]   ;;  %s2678_s5 = inlined_call_operand.vmem [shape: f32[1,32], index: 5, kind: input, shape index: {}]   ;;  %s2679_s6 = inlined_call_operand.vmem [shape: f32[1,32], index: 6, kind: input, shape index: {}]   ;;  %s2680_s7 = inlined_call_operand.vmem [shape: f32[1,32], index: 7, kind: input, shape index: {}]   ;;  %s2681_s8 = inlined_call_operand.vmem [shape: f32[1,32], index: 8, kind: input, shape index: {}]   ;;  %s2682_s9 = inlined_call_operand.vmem [shape: bf16[32,128], index: 9, kind: input, shape index: {}]   ;;  %s2683_s10 = inlined_call_operand.vmem [shape: f32[1,128], index: 10, kind: input, shape index: {}]   ;;  %s2684_s11 = inlined_call_operand.vmem [shape: bf16[128,32], index: 11, kind: input, shape index: {}]   ;;  %s2685_s12 = inlined_call_operand.vmem [shape: f32[1,32], index: 12, kind: input, shape index: {}]   ;;  %s2686_s13 = inlined_call_operand.hbm [shape: f32[2,8,32], index: 13, kind: output, shape index: {}]  }
   0x1   :  { %v2388_v0 = vld [vmem:[%s2673_s0] sm:$0xff]  ;;  %v2393_v1 = vld [vmem:[%s2673_s0 + $0x8] sm:$0xff] }
   0x2   :  { %v49_v2 = vsel %vm48_vm0, %v2388_v0, 0.0  ;;  %v52_v3 = vsel %vm48_vm0, %v2393_v1, 0.0 }
   0x3   :  { %50 = vadd.xlane.f32.xlu0 %v49_v2 }
   0x7   :  { %53 = vadd.xlane.f32.xlu0 %v52_v3 }
   0x8   :  { %18 = vsyncpa [#allocation3], 0  ;;  %v2217_v14 = vld [vmem:[%s2674_s1 + $0x8] sm:$0xff]   ;;  %v2299_v15 = vmov 0.0   ;;  %vm2300_vm1 = vmmov 0   ;;  %v2218_v16 = vld [vmem:[%s2674_s1] sm:$0xff]  }
   0x9   :  { %2061 = vmatprep.subr.bf16.mxu1 %v2299_v15  ;;  %2065 = vmatprep.mubr.msk.bf16.mxu1 %vm2300_vm1, %v2299_v15  ;;  %v1954_v25 = vld [vmem:[%s2678_s5] ss:$0 sm:$0xff]  ;;  %s2301_s5 = smov 96   ;;  %vm165_vm2 = vcmask 64512   ;;  %s2304_s20 = smov 64   ;;  %vm828_vm3 = vcmask 1043456  }
   0xa   :  { %2062 = vmatpush3.bf16.msra.mxu1 %v2217_v14  ;;  %2084 = vmatprep.subr.mxu0 %v2299_v15  ;;  %v1955_v29 = vld [vmem:[%s2679_s6] ss:$0 sm:$0xff]  ;;  %s2303_s6 = smov 120   ;;  %s2305_s21 = smov 56  }
   0xb   :  { %2063 = vmatprep.subr.bf16.mxu1 %v2299_v15  ;;  %2086 = vmatprep.mubr.msk.f32.mxu0 %vm2300_vm1, %v2299_v15  ;;  %v1956_v34 = vld [vmem:[%s2675_s2] ss:$0 sm:$0xff]  ;;  %s2302_s2 = smov 88   ;;  %s2306_s22 = smov 80  }
   0xc   :  { %s2307_s23 = smov 112   ;;  %s2308_s24 = smov 48  }
   0xd   :  { %s2309_s25 = smov 72   ;;  %s2310_s26 = smov 104  }
   0xe   :  { %2064 = vmatpush3.bf16.msra.mxu1 %v2218_v16  ;;  %s2311_s0 = smov 40   ;;  %s2312_s17 = smov [#allocation2]  }
   0xf   :  { %2069 = vmatprep.subr.mxu1 %v2299_v15 }
  0x8c   :  { %v51_v4 = vpop.xlane.xlu0 %50 }
  0x8d   :  { %v56_v5 = vmul.f32 0.03125, %v51_v4 }
  0x8f   :  { %v58_v6 = vsub.f32 %v2388_v0, %v56_v5 }
  0x90   :  { %v54_v7 = vpop.xlane.xlu0 %53 }
  0x91   :  { %v57_v8 = vmul.f32 0.03125, %v54_v7  ;;  %v60_v9 = vmul.f32 %v58_v6, %v58_v6 }
  0x93   :  { %v59_v10 = vsub.f32 %v2393_v1, %v57_v8  ;;  %v62_v11 = vsel %vm48_vm0, %v60_v9, 0.0 }
  0x94   :  { %63 = vadd.xlane.f32.xlu1 %v62_v11 }
  0x95   :  { %v61_v12 = vmul.f32 %v59_v10, %v59_v10 }
  0x97   :  { %v65_v13 = vsel %vm48_vm0, %v61_v12, 0.0 }
  0x98   :  { %66 = vadd.xlane.f32.xlu1 %v65_v13 }
 0x11d   :  { %v64_v17 = vpop.xlane.xlu1 %63 }
 0x11e   :  { %v68_v18 = vmul.f32 0.03125, %v64_v17 }
 0x120   :  { %v70_v19 = vadd.f32 1e-05, %v68_v18 }
 0x121   :  { %v67_v20 = vpop.xlane.xlu1 %66 }
 0x122   :  { %2229 = vrsqrt.f32 %v70_v19  ;;  %v69_v21 = vmul.f32 0.03125, %v67_v20 }
 0x124   :  { %v71_v22 = vadd.f32 1e-05, %v69_v21 }
 0x126   :  { %2231 = vrsqrt.f32 %v71_v22 }
 0x12f   :  { %v2230_v23 = vpop.eup %2229 }
 0x130   :  { %v74_v24 = vmul.f32 %v2230_v23, %v58_v6 }
 0x132   :  { %v83_v28 = vmul.f32 %v1954_v25, %v74_v24 }
 0x133   :  { %v2232_v26 = vpop.eup %2231 }
 0x134   :  { %v75_v27 = vmul.f32 %v2232_v26, %v59_v10  ;;  %v92_v31 = vadd.f32 %v1955_v29, %v83_v28 }
 0x136   :  { %v84_v30 = vmul.f32 %v1954_v25, %v75_v27 }
 0x138   :  { %v93_v32 = vadd.f32 %v1955_v29, %v84_v30 }
 0x13a   :  { %v94_v33 = vpack.c.bf16 %v93_v32, %v92_v31 }
 0x13c   :  { %2066 = vmatmul.mubr.msk.bf16.vlgmr.msra.gmra.mxu1 %vm48_vm0, %v94_v33 }
 0x13d   :  { %2071 = vmatprep.mubr.msk.f32.mxu1 %vm2300_vm1, %v2299_v15 }
 0x1fc   :  { %v155_v35 = vpop.f32.mrf.mxu1 }
 0x1fd   :  { %v2429_v36 = vadd.f32 %v1956_v34, %v155_v35 }
 0x1fe   :  { %v2067_v37 = vpop.f32.mrf.mxu1 }
 0x1ff   :  { %163 = vrot.lane.b32.xlu0 %v2429_v36, %s2301_s5 }
 0x200   :  { %v158_v38 = vpop.f32.mrf.mxu1 }
 0x201   :  { %v2432_v39 = vadd.f32 %v1956_v34, %v158_v38 }
 0x202   :  { %v2068_v40 = vpop.f32.mrf.mxu1 }
 0x203   :  { %241 = vrot.lane.b32.xlu1 %v2432_v39, %s2301_s5 }
 0x271   :  { %v164_v41 = vpop.permute.xlu0 %163 }
 0x272   :  { %2070 = vmatpush3.xpose.msk.msra.mxu1 %vm165_vm2, %v164_v41 }
 0x273   :  { %2074 = vmatprep.subr.mxu1 %v2299_v15 }
 0x275   :  { %2072 = vmatmul.mubr.msk.f32.vlgmr.msra.gmra.mxu1 %vm165_vm2, %v2429_v36  ;;  %v242_v42 = vpop.permute.xlu1 %241 }
 0x276   :  { %2075 = vmatpush3.xpose.msk.msra.mxu1 %vm165_vm2, %v242_v42  ;;  %2076 = vmatprep.mubr.msk.f32.mxu1 %vm2300_vm1, %v2299_v15 }
 0x277   :  { %2079 = vmatprep.subr.mxu1 %v2299_v15 }
 0x279   :  { %2077 = vmatmul.mubr.msk.f32.vlgmr.msra.gmra.mxu1 %vm165_vm2, %v2432_v39 }
 0x27a   :  { %2081 = vmatprep.mubr.msk.f32.mxu1 %vm2300_vm1, %v2299_v15 }
 0x335   :  { %v236_v43 = vpop.f32.mrf.mxu1 }
 0x336   :  { %v317_v48 = vsel %vm165_vm2, %v236_v43, -inf }
 0x337   :  { %v2073_v44 = vpop.f32.mrf.mxu1 }
 0x339   :  { %v313_v45 = vpop.f32.mrf.mxu1 }
 0x33a   :  { %v320_v46 = vsel %vm165_vm2, %v313_v45, -inf }
 0x33b   :  { %321 = vmax.xlane.f32.xlu1 %v320_v46  ;;  %v2078_v47 = vpop.f32.mrf.mxu1 }
 0x34c   :  { %573 = vrot.lane.b32.xlu1 %v2432_v39, %s2302_s2 }
 0x350   :  { %571 = vrot.lane.b32.xlu1 %v2432_v39, %s2303_s6 }
 0x374   :  { %318 = vmax.xlane.f32.xlu1 %v317_v48 }
 0x385   :  { %339 = vrot.lane.b32.xlu1 %v2429_v36, %s2304_s20 }
 0x389   :  { %493 = vrot.lane.b32.xlu1 %v2429_v36, %s2303_s6 }
 0x38d   :  { %747 = vrot.lane.b32.xlu1 %v2432_v39, %s2305_s21 }
 0x391   :  { %875 = vrot.lane.b32.xlu1 %v2429_v36, %s2306_s22 }
 0x395   :  { %953 = vrot.lane.b32.xlu1 %v2432_v39, %s2306_s22 }
 0x3c4   :  { %v322_v49 = vpop.xlane.xlu1 %321 }
 0x3c5   :  { %v324_v50 = vsub.f32 %v313_v45, %v322_v49 }
 0x3c7   :  { %v327_v51 = vmul.f32 1.442695, %v324_v50 }
 0x3c8   :  { %v574_v54 = vpop.permute.xlu1 %573 }
 0x3c9   :  { %2233 = vpow2.f32 %v327_v51 }
 0x3cc   :  { %v572_v55 = vpop.permute.xlu1 %571 }
 0x3d6   :  { %v2234_v52 = vpop.eup %2233 }
 0x3d7   :  { %v332_v53 = vsel %vm165_vm2, %v2234_v52, 0.0 }
 0x3d8   :  { %333 = vadd.xlane.f32.xlu0 %v332_v53 }
 0x3ee   :  { %415 = vrot.lane.b32.xlu0 %v2432_v39, %s2304_s20 }
 0x3fd   :  { %v319_v56 = vpop.xlane.xlu1 %318 }
 0x3fe   :  { %v323_v2 = vsub.f32 %v236_v43, %v319_v56 }
 0x400   :  { %v325_v3 = vmul.f32 1.442695, %v323_v2 }
 0x401   :  { %v340_v57 = vpop.permute.xlu1 %339 }
 0x402   :  { %2080 = vmatpush3.msra.mxu1 %v340_v57 }
 0x403   :  { %2089 = vmatprep.subr.mxu1 %v2299_v15 }
 0x405   :  { %v494_v61 = vpop.permute.xlu1 %493 }
 0x409   :  { %v748_v63 = vpop.permute.xlu1 %747 }
 0x40d   :  { %v876_v23 = vpop.permute.xlu1 %875 }
 0x411   :  { %v954_v26 = vpop.permute.xlu1 %953 }
 0x461   :  { %v334_v58 = vpop.xlane.xlu0 %333 }
 0x462   :  { %2235 = vrcp.f32 %v334_v58 }
 0x463   :  { %2237 = vpow2.f32 %v325_v3 }
 0x465   :  { %v416_v59 = vpop.permute.xlu0 %415 }
 0x466   :  { %2085 = vmatpush3.msra.mxu0 %v416_v59 }
 0x467   :  { %2094 = vmatprep.subr.mxu0 %v2299_v15 }
 0x46f   :  { %v2236_v60 = vpop.eup %2235 }
 0x470   :  { %v338_v62 = vmul.f32 %v2236_v60, %v2234_v52  ;;  %v2238_v8 = vpop.eup %2237 }
 0x471   :  { %v329_v10 = vsel %vm165_vm2, %v2238_v8, 0.0 }
 0x472   :  { %2087 = vmatmul.mubr.msk.f32.vlgmr.msra.gmra.mxu0 %vm165_vm2, %v338_v62 }
 0x473   :  { %2095 = vmatpush3.xpose.msk.msra.mxu0 %vm165_vm2, %v574_v54  ;;  %2096 = vmatprep.mubr.msk.f32.mxu0 %vm2300_vm1, %v2299_v15 }
 0x474   :  { %2104 = vmatprep.subr.mxu0 %v2299_v15 }
 0x476   :  { %2097 = vmatmul.mubr.msk.f32.vlgmr.msra.gmra.mxu0 %vm165_vm2, %v572_v55 }
 0x477   :  { %2105 = vmatpush3.msra.mxu0 %v748_v63  ;;  %2106 = vmatprep.mubr.msk.f32.mxu0 %vm2300_vm1, %v2299_v15 }
 0x478   :  { %2115 = vmatprep.subr.mxu0 %v2299_v15 }
 0x532   :  { %v2471_v4 = vpop.f32.mrf.mxu0 }
 0x534   :  { %v2088_v5 = vpop.f32.mrf.mxu0 }
 0x536   :  { %v645_v6 = vpop.f32.mrf.mxu0 }
 0x537   :  { %v652_v7 = vsel %vm165_vm2, %v645_v6, -inf }
 0x538   :  { %653 = vmax.xlane.f32.xlu0 %v652_v7  ;;  %v2098_v9 = vpop.f32.mrf.mxu0  ;;  %v824_v7 = vld [vmem:[%s2676_s3 + $0x4] sm:$0xf] }
 0x53c   :  { %330 = vadd.xlane.f32.xlu0 %v329_v10 }
 0x5c1   :  { %v654_v11 = vpop.xlane.xlu0 %653 }
 0x5c2   :  { %v656_v12 = vsub.f32 %v645_v6, %v654_v11 }
 0x5c4   :  { %v659_v13 = vmul.f32 1.442695, %v656_v12 }
 0x5c5   :  { %v331_v14 = vpop.xlane.xlu0 %330 }
 0x5c6   :  { %2239 = vpow2.f32 %v659_v13 }
 0x5c7   :  { %2241 = vrcp.f32 %v331_v14 }
 0x5d3   :  { %v2240_v16 = vpop.eup %2239 }
 0x5d4   :  { %v2242_v17 = vpop.eup %2241  ;;  %v664_v18 = vsel %vm165_vm2, %v2240_v16, 0.0 }
 0x5d5   :  { %665 = vadd.xlane.f32.xlu0 %v664_v18  ;;  %v337_v19 = vmul.f32 %v2242_v17, %v2238_v8  ;;  %v830_v8 = vsel %vm828_vm3, %v824_v7, 0 }
 0x5d7   :  { %2082 = vmatmul.mubr.msk.f32.vlgmr.msra.gmra.mxu1 %vm165_vm2, %v337_v19 }
 0x5d8   :  { %2091 = vmatprep.mubr.msk.f32.mxu1 %vm2300_vm1, %v2299_v15 }
 0x5eb   :  { %495 = vrot.lane.b32.xlu0 %v2429_v36, %s2302_s2 }
 0x5ef   :  { %873 = vrot.lane.b32.xlu0 %v2429_v36, %s2307_s23 }
 0x5f3   :  { %951 = vrot.lane.b32.xlu0 %v2432_v39, %s2307_s23 }
 0x65e   :  { %v666_v20 = vpop.xlane.xlu0 %665 }
 0x65f   :  { %2243 = vrcp.f32 %v666_v20 }
 0x662   :  { %v496_v21 = vpop.permute.xlu0 %495 }
 0x663   :  { %2090 = vmatpush3.xpose.msk.msra.mxu1 %vm165_vm2, %v496_v21 }
 0x664   :  { %2099 = vmatprep.subr.mxu1 %v2299_v15 }
 0x666   :  { %2092 = vmatmul.mubr.msk.f32.vlgmr.msra.gmra.mxu1 %vm165_vm2, %v494_v61  ;;  %v874_v25 = vpop.permute.xlu0 %873 }
 0x667   :  { %2101 = vmatprep.mubr.msk.f32.mxu1 %vm2300_vm1, %v2299_v15 }
 0x66a   :  { %v952_v27 = vpop.permute.xlu0 %951 }
 0x66c   :  { %v2244_v22 = vpop.eup %2243 }
 0x66d   :  { %v670_v24 = vmul.f32 %v2244_v22, %v2240_v16 }
 0x66f   :  { %2107 = vmatmul.mubr.msk.f32.vlgmr.msra.gmra.mxu0 %vm165_vm2, %v670_v24 }
 0x670   :  { %2116 = vmatpush3.xpose.msk.msra.mxu0 %vm165_vm2, %v876_v23  ;;  %2117 = vmatprep.mubr.msk.f32.mxu0 %vm2300_vm1, %v2299_v15 }
 0x671   :  { %2120 = vmatprep.subr.mxu0 %v2299_v15 }
 0x673   :  { %2118 = vmatmul.mubr.msk.f32.vlgmr.msra.gmra.mxu0 %vm165_vm2, %v874_v25 }
 0x674   :  { %2121 = vmatpush3.xpose.msk.msra.mxu0 %vm165_vm2, %v954_v26  ;;  %2122 = vmatprep.mubr.msk.f32.mxu0 %vm2300_vm1, %v2299_v15 }
 0x675   :  { %2130 = vmatprep.subr.mxu0 %v2299_v15 }
 0x677   :  { %2123 = vmatmul.mubr.msk.f32.vlgmr.msra.gmra.mxu0 %vm165_vm2, %v952_v27  ;;  %v1204_v27 = vld [vmem:[%s2676_s3 + $0x8] sm:$0xf] }
 0x678   :  { %2132 = vmatprep.mubr.msk.f32.mxu0 %vm2300_vm1, %v2299_v15 }
 0x697   :  { %v2501_v28 = vpop.f32.mrf.mxu1 }
 0x699   :  { %v2083_v29 = vpop.f32.mrf.mxu1 }
 0x69a   :  { %v1209_v29 = vsel %vm828_vm3, %v1204_v27, 0 }
 0x726   :  { %v567_v30 = vpop.f32.mrf.mxu1 }
 0x727   :  { %v649_v31 = vsel %vm165_vm2, %v567_v30, -inf }
 0x728   :  { %650 = vmax.xlane.f32.xlu1 %v649_v31  ;;  %v2093_v32 = vpop.f32.mrf.mxu1 }
 0x72f   :  { %v2504_v33 = vpop.f32.mrf.mxu0 }
 0x731   :  { %v2108_v34 = vpop.f32.mrf.mxu0 }
 0x733   :  { %v2506_v35 = vpop.f32.mrf.mxu0 }
 0x734   :  { %v1029_v53 = vsel %vm165_vm2, %v2506_v35, -inf }
 0x735   :  { %v2119_v37 = vpop.f32.mrf.mxu0 }
 0x737   :  { %v1025_v38 = vpop.f32.mrf.mxu0 }
 0x738   :  { %v1032_v40 = vsel %vm165_vm2, %v1025_v38, -inf }
 0x739   :  { %1033 = vmax.xlane.f32.xlu0 %v1032_v40  ;;  %v2124_v41 = vpop.f32.mrf.mxu0  ;;  %1127 = vrot.lane.b32.xlu1 %v2432_v39, %s2308_s24 }
 0x73d   :  { %1254 = vrot.lane.b32.xlu1 %v2429_v36, %s2309_s25 }
 0x7b1   :  { %v651_v42 = vpop.xlane.xlu1 %650 }
 0x7b2   :  { %v655_v43 = vsub.f32 %v567_v30, %v651_v42 }
 0x7b4   :  { %v657_v44 = vmul.f32 1.442695, %v655_v43 }
 0x7b5   :  { %v1128_v45 = vpop.permute.xlu1 %1127 }
 0x7b6   :  { %2245 = vpow2.f32 %v657_v44  ;;  %2131 = vmatpush3.msra.mxu0 %v1128_v45 }
 0x7b7   :  { %2141 = vmatprep.subr.mxu0 %v2299_v15 }
 0x7b9   :  { %v1255_v56 = vpop.permute.xlu1 %1254 }
 0x7c2   :  { %v1034_v46 = vpop.xlane.xlu0 %1033 }
 0x7c3   :  { %v2246_v47 = vpop.eup %2245  ;;  %v1036_v48 = vsub.f32 %v1025_v38, %v1034_v46 }
 0x7c4   :  { %v661_v49 = vsel %vm165_vm2, %v2246_v47, 0.0 }
 0x7c5   :  { %v1039_v50 = vmul.f32 1.442695, %v1036_v48  ;;  %662 = vadd.xlane.f32.xlu0 %v661_v49 }
 0x7c7   :  { %2247 = vpow2.f32 %v1039_v50 }
 0x7d4   :  { %v2248_v51 = vpop.eup %2247 }
 0x7d5   :  { %v1044_v52 = vsel %vm165_vm2, %v2248_v51, 0.0 }
 0x7d6   :  { %1045 = vadd.xlane.f32.xlu1 %v1044_v52 }
 0x7db   :  { %671 = vrot.lane.b32.xlu0 %v2429_v36, %s2305_s21 }
 0x7df   :  { %1252 = vrot.lane.b32.xlu0 %v2429_v36, %s2310_s26 }
 0x7e3   :  { %1330 = vrot.lane.b32.xlu0 %v2432_v39, %s2310_s26 }
 0x7e7   :  { %1332 = vrot.lane.b32.xlu1 %v2432_v39, %s2309_s25 }
 0x80b   :  { %1030 = vmax.xlane.f32.xlu1 %v1029_v53 }
 0x84e   :  { %v663_v54 = vpop.xlane.xlu0 %662 }
 0x84f   :  { %2249 = vrcp.f32 %v663_v54 }
 0x852   :  { %v672_v55 = vpop.permute.xlu0 %671 }
 0x853   :  { %2100 = vmatpush3.msra.mxu1 %v672_v55 }
 0x854   :  { %2109 = vmatprep.subr.bf16.mxu1 %v2299_v15 }
 0x856   :  { %v1253_v62 = vpop.permute.xlu0 %1252 }
 0x85a   :  { %v1331_v2 = vpop.permute.xlu0 %1330 }
 0x85c   :  { %v2250_v57 = vpop.eup %2249 }
 0x85d   :  { %v669_v58 = vmul.f32 %v2250_v57, %v2246_v47  ;;  %v491_v57 = vpack.c.bf16 %v2471_v4, %v2501_v28 }
 0x85f   :  { %2102 = vmatmul.mubr.msk.f32.vlgmr.msra.gmra.mxu1 %vm165_vm2, %v669_v58  ;;  %v1046_v59 = vpop.xlane.xlu1 %1045  ;;  %v1583_v58 = vld [vmem:[%s2676_s3 + $0xc] sm:$0xf] }
 0x860   :  { %2251 = vrcp.f32 %v1046_v59  ;;  %2111 = vmatprep.mubr.msk.bf16.mxu1 %vm2300_vm1, %v2299_v15  ;;  %2110 = vmatpush3.bf16.msra.mxu1 %v830_v8  ;;  %v1588_v59 = vsel %vm828_vm3, %v1583_v58, 0  ;;  %v2223_v58 = vld [vmem:[%s2684_s11 + $0x28] sm:$0xff]  }
 0x861   :  { %2125 = vmatprep.subr.mxu1 %v2299_v15 }
 0x863   :  { %v1333_v63 = vpop.permute.xlu1 %1332 }
 0x86d   :  { %v2252_v60 = vpop.eup %2251 }
 0x86e   :  { %v1050_v61 = vmul.f32 %v2252_v60, %v2248_v51 }
 0x870   :  { %2133 = vmatmul.mubr.msk.f32.vlgmr.msra.gmra.mxu0 %vm165_vm2, %v1050_v61 }
 0x871   :  { %2142 = vmatpush3.xpose.msk.msra.mxu0 %vm165_vm2, %v1255_v56  ;;  %2143 = vmatprep.mubr.msk.f32.mxu0 %vm2300_vm1, %v2299_v15 }
 0x872   :  { %2146 = vmatprep.subr.mxu0 %v2299_v15 }
 0x874   :  { %2144 = vmatmul.mubr.msk.f32.vlgmr.msra.gmra.mxu0 %vm165_vm2, %v1253_v62 }
 0x875   :  { %2147 = vmatpush3.xpose.msk.msra.mxu0 %vm165_vm2, %v1333_v63  ;;  %2148 = vmatprep.mubr.msk.f32.mxu0 %vm2300_vm1, %v2299_v15 }
 0x876   :  { %2156 = vmatprep.subr.mxu0 %v2299_v15 }
 0x878   :  { %2149 = vmatmul.mubr.msk.f32.vlgmr.msra.gmra.mxu0 %vm165_vm2, %v1331_v2 }
 0x879   :  { %2158 = vmatprep.mubr.msk.f32.mxu0 %vm2300_vm1, %v2299_v15 }
 0x894   :  { %v1031_v3 = vpop.xlane.xlu1 %1030 }
 0x895   :  { %v1035_v5 = vsub.f32 %v2506_v35, %v1031_v3 }
 0x897   :  { %v1037_v6 = vmul.f32 1.442695, %v1035_v5 }
 0x899   :  { %2253 = vpow2.f32 %v1037_v6 }
 0x8a6   :  { %v2254_v9 = vpop.eup %2253 }
 0x8a7   :  { %v1041_v10 = vsel %vm165_vm2, %v2254_v9, 0.0 }
 0x8a8   :  { %1042 = vadd.xlane.f32.xlu0 %v1041_v10 }
 0x8be   :  { %1051 = vrot.lane.b32.xlu0 %v2429_v36, %s2308_s24 }
 0x8c2   :  { %1506 = vrot.lane.b32.xlu0 %v2432_v39, %s2311_s0 }
 0x91f   :  { %v743_v11 = vpop.f32.mrf.mxu1 }
 0x920   :  { %v823_v12 = vpack.c.bf16 %v2504_v33, %v743_v11 }
 0x921   :  { %v2103_v13 = vpop.f32.mrf.mxu1 }
 0x922   :  { %2112 = vmatmul.mubr.msk.bf16.vlgmr.msra.gmra.mxu1 %vm165_vm2, %v823_v12 }
 0x923   :  { %2127 = vmatprep.mubr.msk.f32.mxu1 %vm2300_vm1, %v2299_v15 }
 0x930   :  { %v1199_v14 = vpop.f32.mrf.mxu0 }
 0x931   :  { %v1043_v16 = vpop.xlane.xlu0 %1042 }
 0x932   :  { %2255 = vrcp.f32 %v1043_v16  ;;  %v2134_v17 = vpop.f32.mrf.mxu0 }
 0x934   :  { %v1326_v18 = vpop.f32.mrf.mxu0 }
 0x935   :  { %v1052_v19 = vpop.permute.xlu0 %1051  ;;  %v1408_v20 = vsel %vm165_vm2, %v1326_v18, -inf }
 0x936   :  { %1409 = vmax.xlane.f32.xlu1 %v1408_v20  ;;  %2126 = vmatpush3.msra.mxu1 %v1052_v19  ;;  %v2145_v39 = vpop.f32.mrf.mxu0 }
 0x937   :  { %2135 = vmatprep.subr.bf16.mxu1 %v2299_v15 }
 0x938   :  { %v1404_v21 = vpop.f32.mrf.mxu0 }
 0x939   :  { %v1507_v22 = vpop.permute.xlu0 %1506  ;;  %v1411_v23 = vsel %vm165_vm2, %v1404_v21, -inf }
 0x93a   :  { %1412 = vmax.xlane.f32.xlu1 %v1411_v23  ;;  %v2150_v24 = vpop.f32.mrf.mxu0  ;;  %2157 = vmatpush3.msra.mxu0 %v1507_v22 }
 0x93b   :  { %2167 = vmatprep.subr.bf16.mxu0 %v2299_v15 }
 0x93f   :  { %v2256_v25 = vpop.eup %2255 }
 0x940   :  { %v1049_v26 = vmul.f32 %v2256_v25, %v2254_v9 }
 0x942   :  { %2128 = vmatmul.mubr.msk.f32.vlgmr.msra.gmra.mxu1 %vm165_vm2, %v1049_v26 }
 0x943   :  { %2137 = vmatprep.mubr.msk.bf16.mxu1 %vm2300_vm1, %v2299_v15  ;;  %2136 = vmatpush3.bf16.msra.mxu1 %v1209_v29 }
 0x944   :  { %2151 = vmatprep.subr.mxu1 %v2299_v15 }
 0x9bf   :  { %v1410_v30 = vpop.xlane.xlu1 %1409 }
 0x9c0   :  { %v1414_v31 = vsub.f32 %v1326_v18, %v1410_v30 }
 0x9c2   :  { %v1416_v32 = vmul.f32 1.442695, %v1414_v31 }
 0x9c3   :  { %v1413_v33 = vpop.xlane.xlu1 %1412 }
 0x9c4   :  { %2257 = vpow2.f32 %v1416_v32  ;;  %v1415_v34 = vsub.f32 %v1404_v21, %v1413_v33 }
 0x9c6   :  { %v1418_v35 = vmul.f32 1.442695, %v1415_v34 }
 0x9c8   :  { %2259 = vpow2.f32 %v1418_v35 }
 0x9d1   :  { %v2258_v37 = vpop.eup %2257 }
 0x9d2   :  { %v1420_v38 = vsel %vm165_vm2, %v2258_v37, 0.0 }
 0x9d3   :  { %1421 = vadd.xlane.f32.xlu1 %v1420_v38  ;;  %v2220_v38 = vld [vmem:[%s2682_s9] sm:$0xff]  }
 0x9d5   :  { %v2260_v40 = vpop.eup %2259 }
 0x9d6   :  { %v1423_v41 = vsel %vm165_vm2, %v2260_v40, 0.0 }
 0x9d7   :  { %1424 = vadd.xlane.f32.xlu1 %v1423_v41 }
 0x9e2   :  { %v866_v42 = vpop.f32.mrf.mxu1 }
 0x9e4   :  { %v2113_v43 = vpop.f32.mrf.mxu1 }
 0x9e6   :  { %v869_v44 = vpop.f32.mrf.mxu1 }
 0x9e8   :  { %1430 = vrot.lane.b32.xlu1 %v2429_v36, %s2311_s0  ;;  %v2114_v45 = vpop.f32.mrf.mxu1  ;;  %v492_v36 = vld [vmem:[%s2676_s3] sm:$0xf] }
 0x9e9   :  { %v1635_v56 = vsel %vm828_vm3, %v492_v36, 0 }
 0xa02   :  { %v1123_v46 = vpop.f32.mrf.mxu1 }
 0xa03   :  { %v1203_v47 = vpack.c.bf16 %v1199_v14, %v1123_v46  ;;  %v1988_v14 = vld [vmem:[%s2677_s4] ss:$0 sm:$0xff]  ;;  %s1943_s4 = sshll.u32 %s2312_s17, 4  ;;  %s1944_s4 = int_to_ptr.vmem [resolvable:$true] %s1943_s4 }
 0xa04   :  { %v2129_v48 = vpop.f32.mrf.mxu1  ;;  %s2277_s18 = scalar_lea.vmem %s1944_s4, 256  ;;  %p2282_p1 = scmp.lt.s32.totalorder %s1944_s4, %s1944_s4 }
 0xa05   :  { %2138 = vmatmul.mubr.msk.bf16.vlgmr.msra.gmra.mxu1 %vm165_vm2, %v1203_v47  ;;  %v1989_v48 = vld [vmem:[%s2680_s7] ss:$0 sm:$0xff]  ;;  %p2278_p0 = scmp.ne.s32.totalorder %s1944_s4, %s2277_s18  ;;  %p2283_p2 = scmp.lt.s32.totalorder %s2277_s18, %s2277_s18 }
 0xa06   :  { %2153 = vmatprep.mubr.msk.f32.mxu1 %vm2300_vm1, %v2299_v15 }
 0xa07   :  { %p2284_p3 = por %p2283_p2, %p2282_p1 }
 0xa09   :  { %p2285_p4 = pnand %p2284_p3, %p2278_p0 }
 0xa5c   :  { %v1422_v49 = vpop.xlane.xlu1 %1421 }
 0xa5d   :  { %2261 = vrcp.f32 %v1422_v49 }
 0xa60   :  { %v1425_v50 = vpop.xlane.xlu1 %1424 }
 0xa61   :  { %2263 = vrcp.f32 %v1425_v50 }
 0xa64   :  { %v1431_v51 = vpop.permute.xlu1 %1430 }
 0xa65   :  { %2152 = vmatpush3.msra.mxu1 %v1431_v51 }
 0xa66   :  { %2161 = vmatprep.subr.bf16.mxu1 %v2299_v15 }
 0xa6a   :  { %v2262_v52 = vpop.eup %2261 }
 0xa6b   :  { %v1428_v53 = vmul.f32 %v2262_v52, %v2258_v37  ;;  %v2219_v37 = vld [vmem:[%s2682_s9 + $0x8] sm:$0xff]   ;;  %v1990_v52 = vld [vmem:[%s2681_s8] ss:$0 sm:$0xff] }
 0xa6d   :  { %2154 = vmatmul.mubr.msk.f32.vlgmr.msra.gmra.mxu1 %vm165_vm2, %v1428_v53 }
 0xa6e   :  { %v2264_v54 = vpop.eup %2263  ;;  %2163 = vmatprep.mubr.msk.bf16.mxu1 %vm2300_vm1, %v2299_v15  ;;  %2162 = vmatpush3.bf16.msra.mxu1 %v1588_v59  ;;  %v2224_v59 = vld [vmem:[%s2684_s11 + $0x20] sm:$0xff]  }
 0xa6f   :  { %v1429_v55 = vmul.f32 %v2264_v54, %v2260_v40  ;;  %2173 = vmatprep.subr.bf16.mxu1 %v2299_v15 }
 0xa71   :  { %2159 = vmatmul.mubr.msk.f32.vlgmr.msra.gmra.mxu0 %vm165_vm2, %v1429_v55 }
 0xa72   :  { %2168 = vmatpush3.bf16.msra.mxu0 %v1635_v56  ;;  %2169 = vmatprep.mubr.msk.bf16.mxu0 %vm2300_vm1, %v2299_v15  ;;  %v2221_v56 = vld [vmem:[%s2684_s11 + $0x38] sm:$0xff]  }
 0xa73   :  { %2181 = vmatprep.subr.bf16.mxu0 %v2299_v15 }
 0xa75   :  { %2170 = vmatmul.mubr.msk.bf16.vlgmr.msra.gmra.mxu0 %vm165_vm2, %v491_v57  ;;  %v2222_v57 = vld [vmem:[%s2684_s11 + $0x30] sm:$0xff]  }
 0xa76   :  { %2197 = vmatprep.mubr.msk.bf16.mxu0 %vm2300_vm1, %v2299_v15  ;;  %2182 = vmatpush3.bf16.msra.mxu0 %v2221_v56 }
 0xa77   :  { %2183 = vmatprep.subr.bf16.mxu0 %v2299_v15 }
 0xa7a   :  { %2184 = vmatpush3.bf16.msra.mxu0 %v2222_v57 }
 0xa7b   :  { %2185 = vmatprep.subr.bf16.mxu0 %v2299_v15 }
 0xa7e   :  { %2186 = vmatpush3.bf16.msra.mxu0 %v2223_v58 }
 0xa7f   :  { %2187 = vmatprep.subr.bf16.mxu0 %v2299_v15 }
 0xa82   :  { %2188 = vmatpush3.bf16.msra.mxu0 %v2224_v59 }
 0xa83   :  { %2189 = vmatprep.subr.bf16.mxu0 %v2299_v15 }
 0xac5   :  { %v1245_v60 = vpop.f32.mrf.mxu1 }
 0xac7   :  { %v2139_v61 = vpop.f32.mrf.mxu1 }
 0xac8   :  { %v2226_v61 = vld [vmem:[%s2684_s11 + $0x10] sm:$0xff]  }
 0xac9   :  { %v1248_v62 = vpop.f32.mrf.mxu1 }
 0xacb   :  { %v2140_v4 = vpop.f32.mrf.mxu1 }
 0xacc   :  { %v2228_v4 = vld [vmem:[%s2684_s11] sm:$0xff]  }
 0xb2d   :  { %v1502_v28 = vpop.f32.mrf.mxu1 }
 0xb2f   :  { %v2155_v63 = vpop.f32.mrf.mxu1 }
 0xb31   :  { %v1578_v2 = vpop.f32.mrf.mxu0 }
 0xb32   :  { %v1582_v3 = vpack.c.bf16 %v1578_v2, %v1502_v28  ;;  %v1991_v28 = vld [vmem:[%s2683_s10] ss:$0 sm:$0xff] }
 0xb33   :  { %v2160_v5 = vpop.f32.mrf.mxu0 }
 0xb34   :  { %2164 = vmatmul.mubr.msk.bf16.vlgmr.msra.gmra.mxu1 %vm165_vm2, %v1582_v3 }
 0xb35   :  { %v1671_v6 = vpop.f32.mrf.mxu0  ;;  %2177 = vmatprep.mubr.msk.bf16.mxu1 %vm2300_vm1, %v2299_v15  ;;  %2174 = vmatpush3.bf16.msra.mxu1 %v2219_v37 }
 0xb36   :  { %v1672_v10 = vadd.f32 %v1671_v6, %v866_v42  ;;  %2175 = vmatprep.subr.bf16.mxu1 %v2299_v15 }
 0xb37   :  { %v2171_v7 = vpop.f32.mrf.mxu0 }
 0xb38   :  { %v1678_v12 = vadd.f32 %v1672_v10, %v1245_v60  ;;  %v2225_v60 = vld [vmem:[%s2684_s11 + $0x18] sm:$0xff]  }
 0xb39   :  { %v1674_v8 = vpop.f32.mrf.mxu0  ;;  %2176 = vmatpush3.bf16.msra.mxu1 %v2220_v38  ;;  %2190 = vmatpush3.bf16.msra.mxu0 %v2225_v60 }
 0xb3a   :  { %v1675_v11 = vadd.f32 %v1674_v8, %v869_v44  ;;  %2191 = vmatprep.subr.bf16.mxu0 %v2299_v15 }
 0xb3b   :  { %v2172_v9 = vpop.f32.mrf.mxu0 }
 0xb3c   :  { %v1679_v19 = vadd.f32 %v1675_v11, %v1248_v62  ;;  %v2227_v62 = vld [vmem:[%s2684_s11 + $0x8] sm:$0xff]  }
 0xb3d   :  { %2192 = vmatpush3.bf16.msra.mxu0 %v2226_v61 }
 0xb3e   :  { %2193 = vmatprep.subr.bf16.mxu0 %v2299_v15 }
 0xb41   :  { %2194 = vmatpush3.bf16.msra.mxu0 %v2227_v62 }
 0xb42   :  { %2195 = vmatprep.subr.bf16.mxu0 %v2299_v15 }
 0xb45   :  { %2196 = vmatpush3.bf16.msra.mxu0 %v2228_v4 }
 0xbf4   :  { %v1624_v13 = vpop.f32.mrf.mxu1 }
 0xbf5   :  { %v1680_v16 = vadd.f32 %v1678_v12, %v1624_v13 }
 0xbf6   :  { %v2165_v17 = vpop.f32.mrf.mxu1 }
 0xbf7   :  { %v1689_v18 = vadd.f32 %v1988_v14, %v1680_v16 }
 0xbf8   :  { %v1627_v20 = vpop.f32.mrf.mxu1 }
 0xbf9   :  { %v2602_v39 = vadd.f32 %v1689_v18, %v2388_v0  ;;  %v1681_v21 = vadd.f32 %v1679_v19, %v1627_v20 }
 0xbfa   :  { %v2166_v22 = vpop.f32.mrf.mxu1 }
 0xbfb   :  { %v1690_v23 = vadd.f32 %v1988_v14, %v1681_v21  ;;  %v1693_v24 = vsel %vm48_vm0, %v2602_v39, 0.0  ;;  %v1997_v21 = vld [vmem:[%s2685_s12] ss:$0 sm:$0xff] }
 0xbfc   :  { %1694 = vadd.xlane.f32.xlu0 %v1693_v24 }
 0xbfd   :  { %v2607_v25 = vadd.f32 %v1690_v23, %v2393_v1 }
 0xbff   :  { %v1696_v26 = vsel %vm48_vm0, %v2607_v25, 0.0 }
 0xc00   :  { %1697 = vadd.xlane.f32.xlu1 %v1696_v26 }
 0xc85   :  { %v1695_v27 = vpop.xlane.xlu0 %1694 }
 0xc86   :  { %v1699_v29 = vmul.f32 0.03125, %v1695_v27 }
 0xc88   :  { %v1701_v30 = vsub.f32 %v2602_v39, %v1699_v29 }
 0xc89   :  { %v1698_v0 = vpop.xlane.xlu1 %1697 }
 0xc8a   :  { %v1700_v31 = vmul.f32 0.03125, %v1698_v0  ;;  %v1703_v32 = vmul.f32 %v1701_v30, %v1701_v30 }
 0xc8c   :  { %v1702_v33 = vsub.f32 %v2607_v25, %v1700_v31  ;;  %v1705_v34 = vsel %vm48_vm0, %v1703_v32, 0.0 }
 0xc8d   :  { %1706 = vadd.xlane.f32.xlu0 %v1705_v34 }
 0xc8e   :  { %v1704_v35 = vmul.f32 %v1702_v33, %v1702_v33 }
 0xc90   :  { %v1708_v1 = vsel %vm48_vm0, %v1704_v35, 0.0 }
 0xc91   :  { %1709 = vadd.xlane.f32.xlu0 %v1708_v1 }
 0xd16   :  { %v1707_v40 = vpop.xlane.xlu0 %1706 }
 0xd17   :  { %v1711_v41 = vmul.f32 0.03125, %v1707_v40 }
 0xd19   :  { %v1713_v42 = vadd.f32 1e-05, %v1711_v41 }
 0xd1a   :  { %v1710_v43 = vpop.xlane.xlu0 %1709 }
 0xd1b   :  { %2265 = vrsqrt.f32 %v1713_v42  ;;  %v1712_v44 = vmul.f32 0.03125, %v1710_v43 }
 0xd1d   :  { %v1714_v45 = vadd.f32 1e-05, %v1712_v44 }
 0xd1f   :  { %2267 = vrsqrt.f32 %v1714_v45 }
 0xd28   :  { %v2266_v46 = vpop.eup %2265 }
 0xd29   :  { %v1717_v47 = vmul.f32 %v2266_v46, %v1701_v30 }
 0xd2b   :  { %v1726_v51 = vmul.f32 %v1989_v48, %v1717_v47 }
 0xd2c   :  { %v2268_v49 = vpop.eup %2267 }
 0xd2d   :  { %v1718_v50 = vmul.f32 %v2268_v49, %v1702_v33  ;;  %v1735_v36 = vadd.f32 %v1990_v52, %v1726_v51 }
 0xd2f   :  { %v1727_v53 = vmul.f32 %v1989_v48, %v1718_v50 }
 0xd31   :  { %v1736_v54 = vadd.f32 %v1990_v52, %v1727_v53 }
 0xd33   :  { %v1737_v55 = vpack.c.bf16 %v1736_v54, %v1735_v36 }
 0xd35   :  { %2178 = vmatmul.mubr.msk.bf16.vlgmr.msra.gmra.mxu1 %vm48_vm0, %v1737_v55 }
 0xdf5   :  { %v1798_v63 = vpop.f32.mrf.mxu1 }
 0xdf6   :  { %v1799_v2 = vadd.f32 %v1991_v28, %v1798_v63 }
 0xdf7   :  { %v2179_v3 = vpop.f32.mrf.mxu1 }
 0xdf8   :  { %v1995_v5 = vmul.f32 -1.702, %v1799_v2 }
 0xdf9   :  { %v1801_v6 = vpop.f32.mrf.mxu1 }
 0xdfa   :  { %v1809_v7 = vmul.f32 1.442695, %v1995_v5  ;;  %v1802_v8 = vadd.f32 %v1991_v28, %v1801_v6 }
 0xdfb   :  { %v2180_v9 = vpop.f32.mrf.mxu1 }
 0xdfc   :  { %2269 = vpow2.f32 %v1809_v7  ;;  %v1996_v10 = vmul.f32 -1.702, %v1802_v8 }
 0xdfe   :  { %v1811_v15 = vmul.f32 1.442695, %v1996_v10 }
 0xe00   :  { %2271 = vpow2.f32 %v1811_v15 }
 0xe09   :  { %v2270_v11 = vpop.eup %2269 }
 0xe0a   :  { %v1813_v12 = vadd.f32 1.0, %v2270_v11 }
 0xe0c   :  { %2273 = vrcp.f32 %v1813_v12 }
 0xe0d   :  { %v2272_v13 = vpop.eup %2271 }
 0xe0e   :  { %v1814_v14 = vadd.f32 1.0, %v2272_v13 }
 0xe10   :  { %2275 = vrcp.f32 %v1814_v14 }
 0xe19   :  { %v2274_v16 = vpop.eup %2273 }
 0xe1a   :  { %v1819_v18 = vmul.f32 %v2274_v16, %v1799_v2 }
 0xe1d   :  { %v2276_v17 = vpop.eup %2275 }
 0xe1e   :  { %v1820_v19 = vmul.f32 %v2276_v17, %v1802_v8 }
 0xe20   :  { %v1821_v20 = vpack.c.bf16 %v1820_v19, %v1819_v18 }
 0xe22   :  { %2198 = vmatmul.mubr.bf16.vlgmr.msra.gmra.mxu0 %v1821_v20 }
 0xee2   :  { %v1927_v22 = vpop.f32.mrf.mxu0 }
 0xee3   :  { %v1928_v23 = vadd.f32 %v1997_v21, %v1927_v22 }
 0xee4   :  { %v2199_v24 = vpop.f32.mrf.mxu0 }
 0xee5   :  { %v1934_v26 = vadd.f32 %v1928_v23, %v2602_v39 }
 0xee6   :  { %v1930_v27 = vpop.f32.mrf.mxu0 }
 0xee7   :  { %1936 = vst.msk [vmem:[#allocation2] sm:$0xff] %vm48_vm0, %v1934_v26  ;;  %v1931_v29 = vadd.f32 %v1997_v21, %v1930_v27 }
 0xee8   :  { %v2200_v30 = vpop.f32.mrf.mxu0 }
 0xee9   :  { %v1935_v0 = vadd.f32 %v1931_v29, %v2607_v25 }
 0xeeb   :  { %1937 = vst.msk [vmem:[#allocation2 + $0x8] sm:$0xff] %vm48_vm0, %v1935_v0 }
 0xeec   :  { %2288 = shalt.err (!%p2285_p4)
}
 0xeed   :  { %s2313_s12 = smov 128   ;;  %s2314_s19 = smov 8  }
 0xeee   :  { %1949 = dma.vmem_to_hbm [thread:$0]  %s1944_s4, 256, %s2686_s13, [#allocation3], %s2313_s12, %s2313_s12, %s2314_s19  }
 0xeef   :  { %2297 = dma.done.wait [#allocation3], 256  }
 0xef0   :  { %2298 = vsyncadd [#allocation3], 4294967040 }
 0xef1   :  { %1953 = vsyncpa [#allocation3], 1 }

</bundles_post_ra>
